<compile_context>
chip_gen: v6e
topology: v6e:2x2x1
jax: 0.10.0
libtpu: 0.0.40
codegen_flags: <defaults>
</compile_context>

<pallas_src>
import math

import jax
import jax.numpy as jnp
from jax.experimental import pallas as pl
from jax.experimental.pallas import tpu as pltpu

LANE = 128  # final output dim is zero-padded up to one lane-dense vreg width


def make_mlp_kernel(num_layers):
    """Kernel refs: x, (w0, b0), (w1, b1), ..., out.

    x is read in its native dtype and cast to bf16 in-kernel. Weights are
    (in, out) bf16; biases are (1, out) f32. Matmuls accumulate in f32 on the
    MXU; ReLU is the only VPU op per hidden layer.
    """

    def kernel(*refs):
        x_ref = refs[0]
        o_ref = refs[-1]
        h = x_ref[...].astype(jnp.bfloat16)  # in-kernel cast: no extra HBM pass
        for i in range(num_layers):
            w = refs[1 + 2 * i][...]  # bf16 (in, out)
            b = refs[2 + 2 * i][...]  # f32  (1, out)
            acc = jnp.dot(h, w, preferred_element_type=jnp.float32) + b
            if i < num_layers - 1:  # activation after every layer except last
                h = jnp.maximum(acc, 0.0).astype(jnp.bfloat16)
            else:
                o_ref[...] = acc.astype(o_ref.dtype)  # bf16 lane-dense store

    return kernel


def prepare_params(params, pad_out_to=LANE):
    """One-time (init-time) prep, OFF the hot path:
      - transpose W (out,in) -> (in,out)
      - zero-pad the LAST layer's output dim up to `pad_out_to` lanes
      - cast weights to bf16, biases stay f32 with shape (1, out)
    Contraction dim (784) and hidden dims are intentionally left unpadded.
    """
    prepped = []
    n = len(params)
    for i, (w, b) in enumerate(params):
        wt = jnp.asarray(w, jnp.float32).T            # (in, out)
        br = jnp.asarray(b, jnp.float32).reshape(1, -1)
        if i == n - 1 and wt.shape[1] < pad_out_to:
            pad = pad_out_to - wt.shape[1]
            wt = jnp.pad(wt, ((0, 0), (0, pad)))      # zero cols -> zero logits
            br = jnp.pad(br, ((0, 0), (0, pad)))
        prepped.append((wt.astype(jnp.bfloat16), br))
    return prepped


def _resident_spec(shape):
    # Helper (not a comprehension lambda) so each spec captures ITS OWN shape.
    return pl.BlockSpec(shape, lambda i: (0,) * len(shape))


def _choose_tm(batch, target=1024, num_cores=2):
    """Batch tile: big enough to amortize per-step overhead, small enough that
    the grid has >=2 steps (v7x megacore) whenever the batch allows it."""
    if batch <= 8:
        return batch                       # single block == full batch dim
    if batch <= num_cores * target:
        tm = -(-batch // num_cores)        # ceil(batch / num_cores)
        tm = ((tm + 7) // 8) * 8           # sublane-aligned
        return min(tm, (batch // 8) * 8)   # keep tm <= batch, multiple of 8
    return target


def mlp_forward(x_nchw, prepped, out_features, *, tm=None):
    """prepped: output of prepare_params(); out_features: true logits dim (10)."""
    B = x_nchw.shape[0]
    x = x_nchw.reshape(B, -1)                # nn.Flatten; view-level reshape only
    in_dim = x.shape[1]
    num_layers = len(prepped)
    out_pad = prepped[-1][0].shape[1]        # lane-dense (>=128) output width

    if tm is None:
        tm = _choose_tm(B)
    tm = min(tm, B)
    if tm != B:
        tm = max(8, (tm // 8) * 8)           # block dim must be 8-aligned or == B
    grid = (pl.cdiv(B, tm),)                 # partial last block handled by Pallas

    args = [x]
    in_specs = [pl.BlockSpec((tm, in_dim), lambda i: (i, 0))]  # tiled over batch
    for (wt, br) in prepped:
        args.append(wt)
        in_specs.append(_resident_spec(wt.shape))  # weights stay VMEM-resident
        args.append(br)
        in_specs.append(_resident_spec(br.shape))

    flops = 2 * B * sum(w.shape[0] * w.shape[1] for w, _ in prepped)
    bytes_accessed = (
        x.size * x.dtype.itemsize
        + sum(w.size * w.dtype.itemsize + b.size * b.dtype.itemsize
              for w, b in prepped)
        + B * out_pad * 2
    )

    out = pl.pallas_call(
        make_mlp_kernel(num_layers),
        out_shape=jax.ShapeDtypeStruct((B, out_pad), jnp.bfloat16),
        grid=grid,
        in_specs=in_specs,
        out_specs=pl.BlockSpec((tm, out_pad), lambda i: (i, 0)),
        compiler_params=pltpu.CompilerParams(
            dimension_semantics=("parallel",),  # batch rows are independent
        ),
        cost_estimate=pl.CostEstimate(
            flops=flops, transcendentals=0, bytes_accessed=bytes_accessed),
    )(*args)

    return out[:, :out_features].astype(jnp.float32)


def init_linear(key, in_features, out_features):
    """Deterministic init mirroring torch.nn.Linear defaults (uniform +/- 1/sqrt(in))."""
    kw, kb = jax.random.split(key)
    bound = 1.0 / math.sqrt(in_features)
    w = jax.random.uniform(kw, (out_features, in_features), jnp.float32, -bound, bound)
    b = jax.random.uniform(kb, (out_features,), jnp.float32, -bound, bound)
    return w, b


if __name__ == "__main__":
    key = jax.random.PRNGKey(0)

    hidden_layer_sizes = [128, 64]
    in_dim = 28 * 28
    out_dim = 10

    # Linear(784,128) -> ReLU -> Linear(128,64) -> ReLU -> Linear(64,10)
    sizes = [in_dim] + hidden_layer_sizes + [out_dim]
    keys = jax.random.split(key, len(sizes) + 1)
    params = [init_linear(keys[i], sizes[i], sizes[i + 1]) for i in range(len(sizes) - 1)]

    # One-time parameter prep (transpose / pad / bf16) — off the hot path.
    prepped = prepare_params(params)

    def reference(x_img):
        # Plain-JAX reference using the same bf16-operand / f32-accumulate recipe.
        h = x_img.reshape(x_img.shape[0], -1)
        for i, (w, b) in enumerate(params):
            h = jnp.dot(h.astype(jnp.bfloat16), w.T.astype(jnp.bfloat16),
                        preferred_element_type=jnp.float32) + b
            if i < len(params) - 1:
                h = jnp.maximum(h, 0.0)
        return h

    # Small batch (B=2): single block equal to the full batch dim, no padding.
    x_small = jax.random.normal(keys[-2], (2, 1, 28, 28), jnp.float32)
    out_small = jax.block_until_ready(mlp_forward(x_small, prepped, out_dim))
    assert out_small.shape == (2, 10), out_small.shape
    ref_small = reference(x_small)
    assert jnp.allclose(out_small, ref_small, atol=2e-2, rtol=2e-2), \
        float(jnp.max(jnp.abs(out_small - ref_small)))

    # Medium batch: multi-step grid with a partial last block (no pad copy).
    x_med = jax.random.normal(keys[-1], (130, 1, 28, 28), jnp.float32)
    out_med = jax.block_until_ready(mlp_forward(x_med, prepped, out_dim))
    assert out_med.shape == (130, 10), out_med.shape
    ref_med = reference(x_med)
    assert jnp.allclose(out_med, ref_med, atol=2e-2, rtol=2e-2), \
        float(jnp.max(jnp.abs(out_med - ref_med)))

    print("KERNEL_OK")
</pallas_src>

<mosaic_0001>
module attributes {stable_mosaic.version = 11 : i64} {
  func.func @kernel(%arg0: i32, %arg1: memref<2x784xf32, #tpu.memory_space<vmem>>, %arg2: memref<784x128xbf16, #tpu.memory_space<vmem>>, %arg3: memref<1x128xf32, #tpu.memory_space<vmem>>, %arg4: memref<128x64xbf16, #tpu.memory_space<vmem>>, %arg5: memref<1x64xf32, #tpu.memory_space<vmem>>, %arg6: memref<64x128xbf16, #tpu.memory_space<vmem>>, %arg7: memref<1x128xf32, #tpu.memory_space<vmem>>, %arg8: memref<2x128xbf16, #tpu.memory_space<vmem>>) attributes {dimension_semantics = [#tpu.dimension_semantics<parallel>], iteration_bounds = array<i64: 1>, scalar_prefetch = 0 : i64, scratch_operands = 0 : i64, tpu.core_type = #tpu.core_type<tc>, window_params = [{transform_indices = @transform_0, window_bounds = array<i64: 2, 784>}, {pipeline_mode = #tpu.pipeline_mode<synchronous>, transform_indices = @transform_1, window_bounds = array<i64: 784, 128>}, {pipeline_mode = #tpu.pipeline_mode<synchronous>, transform_indices = @transform_2, window_bounds = array<i64: 1, 128>}, {pipeline_mode = #tpu.pipeline_mode<synchronous>, transform_indices = @transform_3, window_bounds = array<i64: 128, 64>}, {pipeline_mode = #tpu.pipeline_mode<synchronous>, transform_indices = @transform_4, window_bounds = array<i64: 1, 64>}, {pipeline_mode = #tpu.pipeline_mode<synchronous>, transform_indices = @transform_5, window_bounds = array<i64: 64, 128>}, {pipeline_mode = #tpu.pipeline_mode<synchronous>, transform_indices = @transform_6, window_bounds = array<i64: 1, 128>}, {transform_indices = @transform_7, window_bounds = array<i64: 2, 128>}]} {
    %c0 = arith.constant 0 : index
    %c0_0 = arith.constant 0 : index
    %0 = vector.load %arg1[%c0, %c0_0] : memref<2x784xf32, #tpu.memory_space<vmem>>, vector<2x784xf32>
    %1 = arith.truncf %0 : vector<2x784xf32> to vector<2x784xbf16>
    %c0_1 = arith.constant 0 : index
    %c0_2 = arith.constant 0 : index
    %2 = vector.load %arg2[%c0_1, %c0_2] : memref<784x128xbf16, #tpu.memory_space<vmem>>, vector<784x128xbf16>
    %c0_3 = arith.constant 0 : index
    %c0_4 = arith.constant 0 : index
    %3 = vector.load %arg3[%c0_3, %c0_4] : memref<1x128xf32, #tpu.memory_space<vmem>>, vector<1x128xf32>
    %cst = arith.constant dense<0.000000e+00> : vector<2x128xf32>
    %4 = tpu.matmul %1, %2, %cst {dimension_numbers = #tpu.dot_dimension_numbers<[1], [0], [0], [1], [0, 0, 1, 1], [], []>} : vector<2x784xbf16>, vector<784x128xbf16>, vector<2x128xf32> -> vector<2x128xf32>
    %5 = vector.broadcast %3 : vector<1x128xf32> to vector<2x128xf32>
    %6 = arith.addf %4, %5 : vector<2x128xf32>
    %cst_5 = arith.constant 0.000000e+00 : f32
    %7 = vector.broadcast %cst_5 : f32 to vector<2x128xf32>
    %8 = arith.maximumf %6, %7 : vector<2x128xf32>
    %9 = arith.truncf %8 : vector<2x128xf32> to vector<2x128xbf16>
    %c0_6 = arith.constant 0 : index
    %c0_7 = arith.constant 0 : index
    %10 = vector.load %arg4[%c0_6, %c0_7] : memref<128x64xbf16, #tpu.memory_space<vmem>>, vector<128x64xbf16>
    %c0_8 = arith.constant 0 : index
    %c0_9 = arith.constant 0 : index
    %11 = vector.load %arg5[%c0_8, %c0_9] : memref<1x64xf32, #tpu.memory_space<vmem>>, vector<1x64xf32>
    %cst_10 = arith.constant dense<0.000000e+00> : vector<2x64xf32>
    %12 = tpu.matmul %9, %10, %cst_10 {dimension_numbers = #tpu.dot_dimension_numbers<[1], [0], [0], [1], [0, 0, 1, 1], [], []>} : vector<2x128xbf16>, vector<128x64xbf16>, vector<2x64xf32> -> vector<2x64xf32>
    %13 = vector.broadcast %11 : vector<1x64xf32> to vector<2x64xf32>
    %14 = arith.addf %12, %13 : vector<2x64xf32>
    %cst_11 = arith.constant 0.000000e+00 : f32
    %15 = vector.broadcast %cst_11 : f32 to vector<2x64xf32>
    %16 = arith.maximumf %14, %15 : vector<2x64xf32>
    %17 = arith.truncf %16 : vector<2x64xf32> to vector<2x64xbf16>
    %c0_12 = arith.constant 0 : index
    %c0_13 = arith.constant 0 : index
    %18 = vector.load %arg6[%c0_12, %c0_13] : memref<64x128xbf16, #tpu.memory_space<vmem>>, vector<64x128xbf16>
    %c0_14 = arith.constant 0 : index
    %c0_15 = arith.constant 0 : index
    %19 = vector.load %arg7[%c0_14, %c0_15] : memref<1x128xf32, #tpu.memory_space<vmem>>, vector<1x128xf32>
    %cst_16 = arith.constant dense<0.000000e+00> : vector<2x128xf32>
    %20 = tpu.matmul %17, %18, %cst_16 {dimension_numbers = #tpu.dot_dimension_numbers<[1], [0], [0], [1], [0, 0, 1, 1], [], []>} : vector<2x64xbf16>, vector<64x128xbf16>, vector<2x128xf32> -> vector<2x128xf32>
    %21 = vector.broadcast %19 : vector<1x128xf32> to vector<2x128xf32>
    %22 = arith.addf %20, %21 : vector<2x128xf32>
    %23 = arith.truncf %22 : vector<2x128xf32> to vector<2x128xbf16>
    %c0_17 = arith.constant 0 : index
    %c0_18 = arith.constant 0 : index
    %24 = vector.load %arg8[%c0_17, %c0_18] : memref<2x128xbf16, #tpu.memory_space<vmem>>, vector<2x128xbf16>
    tpu.vector_store %arg8[%c0_17, %c0_18], %23 {strides = array<i32>} : memref<2x128xbf16, #tpu.memory_space<vmem>>, vector<2x128xbf16>,
    return
  }
  func.func @transform_0(%arg0: i32) -> (i32, i32) {
    %c0_i32 = arith.constant 0 : i32
    %c0_i32_0 = arith.constant 0 : i32
    return %arg0, %c0_i32 : i32, i32
  }
  func.func @transform_1(%arg0: i32) -> (i32, i32) {
    %c0_i32 = arith.constant 0 : i32
    %c0_i32_0 = arith.constant 0 : i32
    %c0_i32_1 = arith.constant 0 : i32
    return %c0_i32, %c0_i32_0 : i32, i32
  }
  func.func @transform_2(%arg0: i32) -> (i32, i32) {
    %c0_i32 = arith.constant 0 : i32
    %c0_i32_0 = arith.constant 0 : i32
    %c0_i32_1 = arith.constant 0 : i32
    return %c0_i32, %c0_i32_0 : i32, i32
  }
  func.func @transform_3(%arg0: i32) -> (i32, i32) {
    %c0_i32 = arith.constant 0 : i32
    %c0_i32_0 = arith.constant 0 : i32
    %c0_i32_1 = arith.constant 0 : i32
    return %c0_i32, %c0_i32_0 : i32, i32
  }
  func.func @transform_4(%arg0: i32) -> (i32, i32) {
    %c0_i32 = arith.constant 0 : i32
    %c0_i32_0 = arith.constant 0 : i32
    %c0_i32_1 = arith.constant 0 : i32
    return %c0_i32, %c0_i32_0 : i32, i32
  }
  func.func @transform_5(%arg0: i32) -> (i32, i32) {
    %c0_i32 = arith.constant 0 : i32
    %c0_i32_0 = arith.constant 0 : i32
    %c0_i32_1 = arith.constant 0 : i32
    return %c0_i32, %c0_i32_0 : i32, i32
  }
  func.func @transform_6(%arg0: i32) -> (i32, i32) {
    %c0_i32 = arith.constant 0 : i32
    %c0_i32_0 = arith.constant 0 : i32
    %c0_i32_1 = arith.constant 0 : i32
    return %c0_i32, %c0_i32_0 : i32, i32
  }
  func.func @transform_7(%arg0: i32) -> (i32, i32) {
    %c0_i32 = arith.constant 0 : i32
    %c0_i32_0 = arith.constant 0 : i32
    return %arg0, %c0_i32 : i32, i32
  }
}

</mosaic_0001>

<bundles_post_ra>
// kernel: tpu_custom_call.1
= control target key start
LH: loop header
LB: loop body
LE: loop exit
PB: predicated region body
PF: predicated region fallthrough
CT: control target
= control target key end

     0   :  { %12 = vsyncpa [#allocation3], 0  ;;  %s1295_s0 = inlined_call_operand.vmem [shape: f32[2,784], index: 0, kind: input, shape index: {}]   ;;  %s1296_s1 = inlined_call_operand.hbm [shape: bf16[784,128], index: 1, kind: input, shape index: {}]   ;;  %s1297_s2 = inlined_call_operand.vmem [shape: f32[1,128], index: 2, kind: input, shape index: {}]   ;;  %s1298_s3 = inlined_call_operand.vmem [shape: bf16[128,64], index: 3, kind: input, shape index: {}]   ;;  %s1299_s4 = inlined_call_operand.vmem [shape: f32[1,64], index: 4, kind: input, shape index: {}]   ;;  %s1300_s5 = inlined_call_operand.vmem [shape: bf16[64,128], index: 5, kind: input, shape index: {}]   ;;  %s1301_s6 = inlined_call_operand.vmem [shape: f32[1,128], index: 6, kind: input, shape index: {}]   ;;  %s1302_s7 = inlined_call_operand.hbm [shape: bf16[2,128], index: 7, kind: output, shape index: {}]  }
   0x1   :  { %13 = vsyncpa [#allocation4], 0  ;;  %s1171_s24 = smov [#allocation2]  }
   0x2   :  { %s21_s25 = sshll.u32 %s1171_s24, 4  ;;  %s22_s25 = int_to_ptr.vmem [resolvable:$true] %s21_s25 }
   0x3   :  { %s1135_s26 = scalar_lea.vmem %s22_s25, 6272  ;;  %p1140_p1 = scmp.lt.s32.totalorder %s22_s25, %s22_s25 }
   0x4   :  { %p1136_p0 = scmp.ne.s32.totalorder %s22_s25, %s1135_s26  ;;  %p1141_p2 = scmp.lt.s32.totalorder %s1135_s26, %s1135_s26 }
   0x6   :  { %p1142_p3 = por %p1141_p2, %p1140_p1 }
   0x8   :  { %p1143_p4 = pnand %p1142_p3, %p1136_p0 }
   0xa   :  { %1146 = shalt.err (!%p1143_p4)
}
   0xb   :  { %s1172_s27 = smov 64   ;;  %s1173_s28 = smov 4  }
   0xc   :  { %27 = dma.hbm_to_vmem [thread:$0]  %s1296_s1, 6272, %s22_s25, [#allocation3], %s1172_s27, %s1172_s27, %s1173_s28  }
   0xd   :  { %1167 = dma.done.wait [#allocation3], 6272  }
   0xe   :  { %1168 = vsyncadd [#allocation3], 4294961024  ;;  %v1064_v0 = vld [vmem:[#allocation2 + $0x78] sm:$0xff]   ;;  %v1068_v4 = vld [vmem:[#allocation2 + $0x70] sm:$0xff]   ;;  %v1174_v21 = vmov 1983009808   ;;  %v50_v23 = vlaneseq }
   0xf   :  { %v1065_v1 = vld [vmem:[#allocation2 + $0x38] sm:$0xff]   ;;  %937 = vmatprep.subr.bf16.mxu0 %v1064_v0  ;;  %v1069_v5 = vld [vmem:[#allocation2 + $0x30] sm:$0xff]   ;;  %v1072_v8 = vld [vmem:[#allocation2 + $0x68] sm:$0xff]   ;;  %v48_v22 = vunpack.c.l.s4 %v1174_v21  ;;  %v1175_v45 = vmov 0.0   ;;  %vm1176_vm0 = vmmov 0   ;;  %vm492_vm1 = vcmask 130048  }
  0x10   :  { %v1066_v2 = vld [vmem:[#allocation2 + $0xf8] sm:$0xff]   ;;  %938 = vmatpush3.bf16.msra.mxu0 %v1065_v1  ;;  %v1070_v6 = vld [vmem:[#allocation2 + $0xf0] sm:$0xff]   ;;  %v1073_v9 = vld [vmem:[#allocation2 + $0x28] sm:$0xff]   ;;  %v51_v29 = vshrl.u32 %v50_v23, 7  ;;  %vm810_vm2 = vcmask 523264  }
  0x11   :  { %v1067_v3 = vld [vmem:[#allocation2 + $0xb8] sm:$0xff]   ;;  %959 = vmatprep.subr.bf16.mxu1 %v1066_v2  ;;  %939 = vmatprep.subr.bf16.mxu0 %v1068_v4  ;;  %v1071_v7 = vld [vmem:[#allocation2 + $0xb0] sm:$0xff]   ;;  %v1074_v10 = vld [vmem:[#allocation2 + $0xe8] sm:$0xff]   ;;  %v49_v28 = vunpack.c.0.s8 %v48_v22 }
  0x12   :  { %960 = vmatpush3.bf16.msra.mxu1 %v1067_v3  ;;  %v1075_v11 = vld [vmem:[#allocation2 + $0xa8] sm:$0xff]   ;;  %v1076_v12 = vld [vmem:[#allocation2 + $0x60] sm:$0xff]   ;;  %v1080_v16 = vld [vmem:[#allocation2 + $0x58] sm:$0xff]  }
  0x13   :  { %961 = vmatprep.subr.bf16.mxu1 %v1070_v6  ;;  %v1077_v13 = vld [vmem:[#allocation2 + $0x20] sm:$0xff]   ;;  %v1081_v17 = vld [vmem:[#allocation2 + $0x18] sm:$0xff]   ;;  %v1084_v20 = vld [vmem:[#allocation2 + $0x50] sm:$0xff]   ;;  %v52_v34 = vsub.s32 %v49_v28, %v51_v29 }
  0x14   :  { %940 = vmatpush3.bf16.msra.mxu0 %v1069_v5  ;;  %v1078_v14 = vld [vmem:[#allocation2 + $0xe0] sm:$0xff]   ;;  %v1082_v18 = vld [vmem:[#allocation2 + $0xd8] sm:$0xff]   ;;  %v1085_v24 = vld [vmem:[#allocation2 + $0x10] sm:$0xff]  }
  0x15   :  { %941 = vmatprep.subr.bf16.mxu0 %v1072_v8  ;;  %v1079_v15 = vld [vmem:[#allocation2 + $0xa0] sm:$0xff]   ;;  %v1083_v19 = vld [vmem:[#allocation2 + $0x98] sm:$0xff]   ;;  %v1086_v25 = vld [vmem:[#allocation2 + $0xd0] sm:$0xff]  }
  0x16   :  { %962 = vmatpush3.bf16.msra.mxu1 %v1071_v7  ;;  %v1087_v26 = vld [vmem:[#allocation2 + $0x90] sm:$0xff]   ;;  %v1088_v27 = vld [vmem:[#allocation2 + $0x48] sm:$0xff]   ;;  %v1092_v33 = vld [vmem:[#allocation2 + $0x40] sm:$0xff]  }
  0x17   :  { %963 = vmatprep.subr.bf16.mxu1 %v1074_v10  ;;  %v1089_v30 = vld [vmem:[#allocation2 + $0x8] sm:$0xff]   ;;  %v1093_v35 = vld [vmem:[#allocation2] sm:$0xff]   ;;  %v1096_v41 = vld [vmem:[#allocation2 + $0x178] sm:$0xff]  }
  0x18   :  { %942 = vmatpush3.bf16.msra.mxu0 %v1073_v9  ;;  %v1090_v31 = vld [vmem:[#allocation2 + $0xc8] sm:$0xff]   ;;  %v1094_v36 = vld [vmem:[#allocation2 + $0xc0] sm:$0xff]   ;;  %v1098_v48 = vld [vmem:[#allocation2 + $0x138] sm:$0xff]  }
  0x19   :  { %943 = vmatprep.subr.bf16.mxu0 %v1076_v12  ;;  %v1091_v32 = vld [vmem:[#allocation2 + $0x88] sm:$0xff]   ;;  %v42_v37 = vld [vmem:[%s1295_s0] sm:$0xff]  ;;  %v1099_v50 = vld [vmem:[#allocation2 + $0x170] sm:$0xff]  }
  0x1a   :  { %964 = vmatpush3.bf16.msra.mxu1 %v1075_v11  ;;  %v53_v38 = vrot.slane %v42_v37, %v52_v34  ;;  %v1095_v39 = vld [vmem:[#allocation2 + $0x80] sm:$0xff]   ;;  %v46_v40 = vcombine.high %v42_v37, %v42_v37  ;;  %v1100_v52 = vld [vmem:[#allocation2 + $0x130] sm:$0xff]   ;;  %v1101_v53 = vld [vmem:[#allocation2 + $0x168] sm:$0xff]  }
  0x1b   :  { %965 = vmatprep.subr.bf16.mxu1 %v1078_v14  ;;  %v1102_v54 = vld [vmem:[#allocation2 + $0x128] sm:$0xff]   ;;  %v1103_v55 = vld [vmem:[#allocation2 + $0x160] sm:$0xff]   ;;  %v1105_v57 = vld [vmem:[#allocation2 + $0x158] sm:$0xff]  }
  0x1c   :  { %944 = vmatpush3.bf16.msra.mxu0 %v1077_v13  ;;  %v61_v42 = vcombine.high %v53_v38, %v53_v38  ;;  %v60_v43 = vrot.slane %v46_v40, %v52_v34  ;;  %v86_v44 = vpack.c.bf16 %v53_v38, %v53_v38  ;;  %v1104_v56 = vld [vmem:[#allocation2 + $0x120] sm:$0xff]   ;;  %v43_v59 = vld [vmem:[%s1295_s0 + $0x8] sm:$0x3f]  ;;  %v1106_v60 = vld [vmem:[#allocation2 + $0x118] sm:$0xff]  }
  0x1d   :  { %945 = vmatprep.subr.bf16.mxu0 %v1080_v16  ;;  %v1113_v58 = vld [vmem:[#allocation2 + $0x180] sm:$0xff]   ;;  %v63_v61 = vcombine.high %v43_v59, %v43_v59  ;;  %v70_v62 = vrot.slane %v43_v59, %v52_v34  ;;  %v1107_v63 = vld [vmem:[#allocation2 + $0x150] sm:$0xff]   ;;  %v1109_v5 = vld [vmem:[#allocation2 + $0x148] sm:$0xff]  }
  0x1e   :  { %966 = vmatpush3.bf16.msra.mxu1 %v1079_v15  ;;  %v87_v46 = vpack.c.bf16 %v61_v42, %v61_v42  ;;  %v62_v47 = vcombine.high %v60_v43, %v60_v43  ;;  %v88_v49 = vpack.c.bf16 %v60_v43, %v60_v43  ;;  %v1108_v2 = vld [vmem:[#allocation2 + $0x110] sm:$0xff]   ;;  %v1110_v6 = vld [vmem:[#allocation2 + $0x108] sm:$0xff]   ;;  %v1111_v7 = vld [vmem:[#allocation2 + $0x140] sm:$0xff]  }
  0x1f   :  { %967 = vmatprep.subr.bf16.mxu1 %v1082_v18  ;;  %v77_v0 = vrot.slane %v63_v61, %v52_v34  ;;  %v78_v1 = vcombine.high %v70_v62, %v70_v62  ;;  %v1112_v8 = vld [vmem:[#allocation2 + $0x100] sm:$0xff]   ;;  %v90_v9 = vpack.c.bf16 %v70_v62, %v70_v62  ;;  %v1115_v10 = vld [vmem:[%s1298_s3 + $0x38] sm:$0xff]   ;;  %v1116_v11 = vld [vmem:[%s1298_s3 + $0x30] sm:$0xff]  }
  0x20   :  { %946 = vmatpush3.bf16.msra.mxu0 %v1081_v17  ;;  %528 = vmatprep.mubr.bf16.mxu0 %v87_v46  ;;  %v89_v51 = vpack.c.bf16 %v62_v47, %v62_v47  ;;  %v1117_v12 = vld [vmem:[%s1298_s3 + $0x28] sm:$0xff]   ;;  %v1118_v13 = vld [vmem:[%s1298_s3 + $0x20] sm:$0xff]   ;;  %v1119_v14 = vld [vmem:[%s1298_s3 + $0x18] sm:$0xff]  }
  0x21   :  { %947 = vmatprep.subr.bf16.mxu0 %v1084_v20  ;;  %v91_v3 = vpack.c.bf16 %v78_v1, %v78_v1  ;;  %v92_v4 = vpack.c.bf16 %v77_v0, %v77_v0  ;;  %v1120_v15 = vld [vmem:[%s1298_s3 + $0x10] sm:$0xff]   ;;  %v1121_v16 = vld [vmem:[%s1298_s3 + $0x8] sm:$0xff]   ;;  %v1122_v17 = vld [vmem:[%s1298_s3] sm:$0xff]  }
  0x22   :  { %968 = vmatpush3.bf16.msra.mxu1 %v1083_v19  ;;  %568 = vmatprep.mubr.bf16.mxu1 %v89_v51  ;;  %v1123_v18 = vld [vmem:[%s1300_s5 + $0x18] sm:$0xff]   ;;  %v1124_v19 = vld [vmem:[%s1300_s5 + $0x10] sm:$0xff]   ;;  %v1125_v47 = vld [vmem:[%s1300_s5 + $0x8] sm:$0xff]  }
  0x23   :  { %969 = vmatprep.subr.bf16.mxu1 %v1086_v25 }
  0x24   :  { %948 = vmatpush3.bf16.msra.mxu0 %v1085_v24 }
  0x25   :  { %949 = vmatprep.subr.bf16.mxu0 %v1088_v27 }
  0x26   :  { %970 = vmatpush3.bf16.msra.mxu1 %v1087_v26 }
  0x27   :  { %971 = vmatprep.subr.bf16.mxu1 %v1090_v31 }
  0x28   :  { %950 = vmatpush3.bf16.msra.mxu0 %v1089_v30 }
  0x29   :  { %951 = vmatprep.subr.bf16.mxu0 %v1092_v33  ;;  %v871_v33 = vld [vmem:[%s1297_s2] ss:$0 sm:$0xff] }
  0x2a   :  { %972 = vmatpush3.bf16.msra.mxu1 %v1091_v32 }
  0x2b   :  { %973 = vmatprep.subr.bf16.mxu1 %v1094_v36 }
  0x2c   :  { %952 = vmatpush3.bf16.msra.mxu0 %v1093_v35 }
  0x2d   :  { %981 = vmatprep.subr.bf16.mxu0 %v1096_v41 }
  0x2e   :  { %974 = vmatpush3.bf16.msra.mxu1 %v1095_v39 }
  0x2f   :  { %1019 = vmatprep.subr.bf16.mxu1 %v1175_v45  ;;  %529 = vmatmul.mubr.bf16.vlgmr.msra.gmra.mxu0 %v86_v44 }
  0x30   :  { %982 = vmatpush3.bf16.msra.mxu0 %v1098_v48  ;;  %608 = vmatprep.mubr.bf16.mxu0 %v91_v3  ;;  %v1126_v48 = vld [vmem:[%s1300_s5] sm:$0xff]   ;;  %s1177_s5 = smov [#allocation5]  }
  0x31   :  { %569 = vmatmul.mubr.bf16.vlgmr.msra.gmra.mxu1 %v88_v49  ;;  %983 = vmatprep.subr.bf16.mxu0 %v1099_v50  ;;  %v922_v49 = vld [vmem:[%s1299_s4] ss:$0 sm:$0xff]  ;;  %s862_s13 = sshll.u32 %s1177_s5, 4  ;;  %s863_s13 = int_to_ptr.vmem [resolvable:$true] %s862_s13 }
  0x32   :  { %1021 = vmatprep.mubr.msk.bf16.mxu1 %vm1176_vm0, %v1175_v45  ;;  %1020 = vmatpush3.bf16.msra.mxu1 %v1113_v58  ;;  %s1147_s4 = scalar_lea.vmem %s863_s13, 16  ;;  %s1151_s14 = scalar_lea.vmem %s863_s13, 32 }
  0x33   :  { %1025 = vmatprep.subr.bf16.mxu1 %v1175_v45  ;;  %p1148_p5 = scmp.ne.s32.totalorder %s863_s13, %s1147_s4  ;;  %p1152_p6 = scmp.lt.s32.totalorder %s863_s13, %s863_s13 }
  0x34   :  { %984 = vmatpush3.bf16.msra.mxu0 %v1100_v52  ;;  %p1153_p7 = scmp.lt.s32.totalorder %s1151_s14, %s1147_s4 }
  0x35   :  { %985 = vmatprep.subr.bf16.mxu0 %v1101_v53 }
  0x36   :  { %p1154_p8 = por %p1153_p7, %p1152_p6 }
  0x38   :  { %986 = vmatpush3.bf16.msra.mxu0 %v1102_v54  ;;  %p1155_p9 = pnand %p1154_p8, %p1148_p5 }
  0x39   :  { %987 = vmatprep.subr.bf16.mxu0 %v1103_v55  ;;  %1022 = vmatmul.mubr.msk.bf16.vlgmr.msra.gmra.mxu1 %vm492_vm1, %v92_v4 }
  0x3a   :  { %1041 = vmatprep.mubr.msk.bf16.mxu1 %vm1176_vm0, %v1175_v45  ;;  %1026 = vmatpush3.bf16.msra.mxu1 %v1115_v10 }
  0x3b   :  { %1027 = vmatprep.subr.bf16.mxu1 %v1175_v45 }
  0x3c   :  { %988 = vmatpush3.bf16.msra.mxu0 %v1104_v56 }
  0x3d   :  { %989 = vmatprep.subr.bf16.mxu0 %v1105_v57 }
  0x3e   :  { %1028 = vmatpush3.bf16.msra.mxu1 %v1116_v11 }
  0x3f   :  { %1029 = vmatprep.subr.bf16.mxu1 %v1175_v45 }
  0x40   :  { %990 = vmatpush3.bf16.msra.mxu0 %v1106_v60 }
  0x41   :  { %991 = vmatprep.subr.bf16.mxu0 %v1107_v63 }
  0x42   :  { %1030 = vmatpush3.bf16.msra.mxu1 %v1117_v12 }
  0x43   :  { %1031 = vmatprep.subr.bf16.mxu1 %v1175_v45 }
  0x44   :  { %992 = vmatpush3.bf16.msra.mxu0 %v1108_v2 }
  0x45   :  { %993 = vmatprep.subr.bf16.mxu0 %v1109_v5 }
  0x46   :  { %1032 = vmatpush3.bf16.msra.mxu1 %v1118_v13 }
  0x47   :  { %1033 = vmatprep.subr.bf16.mxu1 %v1175_v45 }
  0x48   :  { %994 = vmatpush3.bf16.msra.mxu0 %v1110_v6 }
  0x49   :  { %995 = vmatprep.subr.bf16.mxu0 %v1111_v7 }
  0x4a   :  { %1034 = vmatpush3.bf16.msra.mxu1 %v1119_v14 }
  0x4b   :  { %1035 = vmatprep.subr.bf16.mxu1 %v1175_v45 }
  0x4c   :  { %996 = vmatpush3.bf16.msra.mxu0 %v1112_v8 }
  0x4d   :  { %1045 = vmatprep.subr.bf16.mxu0 %v1175_v45 }
  0x4e   :  { %1036 = vmatpush3.bf16.msra.mxu1 %v1120_v15 }
  0x4f   :  { %609 = vmatmul.mubr.bf16.vlgmr.msra.gmra.mxu0 %v90_v9  ;;  %1037 = vmatprep.subr.bf16.mxu1 %v1175_v45 }
  0x50   :  { %1053 = vmatprep.mubr.msk.bf16.mxu0 %vm1176_vm0, %v1175_v45  ;;  %1046 = vmatpush3.bf16.msra.mxu0 %v1123_v18 }
  0x51   :  { %1047 = vmatprep.subr.bf16.mxu0 %v1175_v45 }
  0x52   :  { %1038 = vmatpush3.bf16.msra.mxu1 %v1121_v16 }
  0x53   :  { %1039 = vmatprep.subr.bf16.mxu1 %v1175_v45 }
  0x54   :  { %1048 = vmatpush3.bf16.msra.mxu0 %v1124_v19 }
  0x55   :  { %1049 = vmatprep.subr.bf16.mxu0 %v1175_v45 }
  0x56   :  { %1040 = vmatpush3.bf16.msra.mxu1 %v1122_v17 }
  0x58   :  { %1050 = vmatpush3.bf16.msra.mxu0 %v1125_v47 }
  0x59   :  { %1051 = vmatprep.subr.bf16.mxu0 %v1175_v45  ;;  %v931_v45 = vld [vmem:[%s1301_s6] ss:$0 sm:$0xff] }
  0x5c   :  { %1052 = vmatpush3.bf16.msra.mxu0 %v1126_v48 }
  0xef   :  { %v953_v20 = vpop.f32.mrf.mxu0 }
  0xf1   :  { %v954_v21 = vpop.f32.mrf.mxu0  ;;  %v975_v22 = vpop.f32.mrf.mxu1 }
  0xf2   :  { %v955_v32 = vadd.f32 %v954_v21, %v953_v20 }
  0xf3   :  { %v956_v23 = vpop.f32.mrf.mxu0  ;;  %v976_v24 = vpop.f32.mrf.mxu1 }
  0xf4   :  { %v531_v34 = vadd.f32 %v955_v32, %v871_v33  ;;  %v977_v35 = vadd.f32 %v976_v24, %v975_v22 }
  0xf5   :  { %v957_v25 = vpop.f32.mrf.mxu0  ;;  %v978_v26 = vpop.f32.mrf.mxu1 }
  0xf6   :  { %v571_v38 = vadd.f32 %v977_v35, %v531_v34 }
  0xf7   :  { %v979_v27 = vpop.f32.mrf.mxu1 }
  0xf9   :  { %v650_v28 = vpop.f32.mrf.mxu1 }
  0xfb   :  { %v1023_v29 = vpop.f32.mrf.mxu1 }
  0xfd   :  { %v653_v30 = vpop.f32.mrf.mxu1 }
  0xff   :  { %v1024_v31 = vpop.f32.mrf.mxu1 }
 0x10f   :  { %v997_v36 = vpop.f32.mrf.mxu0 }
 0x111   :  { %v998_v37 = vpop.f32.mrf.mxu0 }
 0x112   :  { %v999_v39 = vadd.f32 %v998_v37, %v997_v36 }
 0x113   :  { %v1000_v40 = vpop.f32.mrf.mxu0 }
 0x114   :  { %v611_v41 = vadd.f32 %v999_v39, %v571_v38 }
 0x115   :  { %v1001_v42 = vpop.f32.mrf.mxu0 }
 0x116   :  { %v651_v43 = vadd.f32 %v650_v28, %v611_v41 }
 0x118   :  { %v656_v44 = vmax.f32 %v651_v43, 0.0 }
 0x11a   :  { %v657_v46 = vpack.c.bf16 %v656_v44, %v656_v44 }
 0x11c   :  { %1042 = vmatmul.mubr.bf16.vlgmr.msra.gmra.mxu1 %v657_v46 }
 0x1dc   :  { %v763_v50 = vpop.f32.mrf.mxu1 }
 0x1dd   :  { %v764_v51 = vadd.f32 %v922_v49, %v763_v50 }
 0x1de   :  { %v1043_v52 = vpop.f32.mrf.mxu1 }
 0x1df   :  { %v769_v53 = vmax.f32 %v764_v51, 0.0 }
 0x1e0   :  { %v766_v54 = vpop.f32.mrf.mxu1 }
 0x1e1   :  { %v770_v55 = vpack.c.bf16 %v769_v53, %v769_v53 }
 0x1e2   :  { %v1044_v56 = vpop.f32.mrf.mxu1 }
 0x1e3   :  { %1054 = vmatmul.mubr.msk.bf16.vlgmr.msra.gmra.mxu0 %vm810_vm2, %v770_v55 }
 0x2a3   :  { %v848_v57 = vpop.f32.mrf.mxu0 }
 0x2a4   :  { %v849_v58 = vadd.f32 %v931_v45, %v848_v57 }
 0x2a5   :  { %v1055_v59 = vpop.f32.mrf.mxu0 }
 0x2a6   :  { %v854_v60 = vpack.c.bf16 %v849_v58, %v849_v58 }
 0x2a7   :  { %v851_v61 = vpop.f32.mrf.mxu0 }
 0x2a8   :  { %855 = vst [vmem:[#allocation5] sm:$0x1] %v854_v60 }
 0x2a9   :  { %v1056_v62 = vpop.f32.mrf.mxu0 }
 0x2aa   :  { %1158 = shalt.err (!%p1155_p9)
}
 0x2ab   :  { %865 = dma.vmem_to_hbm [thread:$0]  %s863_s13, 16, %s1302_s7, [#allocation4]  }
 0x2ac   :  { %1169 = dma.done.wait [#allocation4], 16  }
 0x2ad   :  { %1170 = vsyncadd [#allocation4], 4294967280 }
 0x2ae   :  { %869 = vsyncpa [#allocation3], 1 }
 0x2af   :  { %870 = vsyncpa [#allocation4], 1 }

</bundles_post_ra>
